<compile_context>
chip_gen: v6e
topology: v6e:2x2x1
jax: 0.10.0
libtpu: 0.0.40
codegen_flags: <defaults>
</compile_context>

<pallas_src>
import math

import jax
import jax.numpy as jnp
from jax.experimental import pallas as pl
from jax.experimental.pallas import tpu as pltpu

SEQ_LEN = 82      # hardcoded in the reference forward (.expand(x.size(0), 82, 64))
D_MODEL = 64
MAX_SEQ_LEN = 128
FLAT = SEQ_LEN * D_MODEL  # 5248 = 41 * 128 -> lane-dense trailing dim

_VMEM_LIMIT_BYTES = 32 << 20   # explicit scoped-VMEM budget (safe on v5e/v6e/v7x)
_VMEM_CAP_ROWS = 128           # 4 * 128 * 5248 * 4B ≈ 10.3 MiB of blocks << limit


def _build_pe_table(d_model: int, max_seq_len: int) -> jnp.ndarray:
    """Reproduce the __init__ pe buffer exactly (including the reference's
    +log(10000)/d_model sign in div_term — reproduced verbatim)."""
    position = jnp.arange(0.0, max_seq_len, dtype=jnp.float32)[:, None]          # (L, 1)
    div_term = jnp.exp(
        jnp.arange(0.0, d_model, 2, dtype=jnp.float32) * (math.log(10000.0) / d_model)
    )                                                                             # (D/2,)
    angles = position * div_term                                                  # (L, D/2)
    pe = jnp.zeros((max_seq_len, d_model), dtype=jnp.float32)
    pe = pe.at[:, 0::2].set(jnp.sin(angles))
    pe = pe.at[:, 1::2].set(jnp.cos(angles))
    return pe[None, :, :]                                                         # (1, L, D)


def _pe_add_kernel(x_ref, pe_ref, o_ref):
    # x_ref: (tb, FLAT) lane-dense batch block.
    # pe_ref: (8, FLAT) VMEM-resident PE table (constant block index -> fetched once).
    tb = x_ref.shape[0]
    x = x_ref[...]
    pe8 = pe_ref[...]
    if tb >= 8 and tb % 8 == 0:
        # Sublane-aligned add: group rows by 8 so pe reuse is pure vreg reuse
        # (no per-step sublane broadcast).  The reshape does not cross (8,128)
        # tile boundaries (FLAT = 41*128), so it is a layout no-op.
        g = tb // 8
        o_ref[...] = (x.reshape(g, 8, FLAT) + pe8[None, :, :]).reshape(tb, FLAT)
    else:
        # Tiny whole-batch block (tb = B <= 8, possibly not sublane-aligned).
        o_ref[...] = x + pe8[:tb, :]


def _choose_tb(batch: int) -> int:
    """Pick the batch block size.

    - batch <= 8: one whole-batch block (block dim equals the full array dim,
      so the (8,128) rule is satisfied even for tiny batches).
    - otherwise: sublane-aligned (multiple of 8) block chosen so that
        * the grid has >= 2 steps for B >= 16 (v7x 2-TC megacore split),
        * the grid has >= 4 steps for B >= 64 (software pipelining overlap),
        * 2x double-buffered in + out blocks stay well inside the scoped VMEM
          budget on every generation (cap of 128 rows ≈ 10.3 MiB total, under
          even v5e's 16 MiB default).
      Partial last blocks are handled by Pallas OOB masking (safe for a pure
      elementwise add with no output aliasing).
    """
    if batch <= 8:
        return batch
    min_steps = 4 if batch >= 64 else 2
    tb = pl.cdiv(batch, min_steps)
    tb = ((tb + 7) // 8) * 8                     # sublane-aligned
    return max(8, min(tb, _VMEM_CAP_ROWS))


def positional_encoding_forward(
    x: jnp.ndarray,
    pe_full: jnp.ndarray,
    *,
    allow_xla_fallback: bool = False,
) -> jnp.ndarray:
    """x: (B, S, D) float32.  pe_full: (1, max_seq_len, D) buffer."""
    B, S, D = x.shape
    assert S == SEQ_LEN and D == D_MODEL, "reference forward hardcodes (82, 64)"
    assert S <= pe_full.shape[1], "pe table shorter than sequence length"

    # pe[:, :x.size(1)] — slicing is glue, done in plain JAX.
    pe = pe_full[:, :S, :]                                                        # (1, S, D)

    if allow_xla_fallback and B <= 8:
        # For tiny batches the fixed kernel-launch / per-step overhead dominates;
        # let XLA fuse the broadcast-add instead.
        return x + pe

    # Lane-dense reshape: trailing dim 5248 = 41*128 -> unmasked full-width stores.
    x2d = x.reshape(B, FLAT)
    # Pre-broadcast the PE row to 8 sublanes (≈168 KB) so the in-kernel add is
    # vreg-aligned reuse; constant block index keeps it VMEM-resident.
    pe8 = jnp.broadcast_to(pe.reshape(1, FLAT), (8, FLAT))

    tb = _choose_tb(B)
    grid = (pl.cdiv(B, tb),)

    out2d = pl.pallas_call(
        _pe_add_kernel,
        out_shape=jax.ShapeDtypeStruct((B, FLAT), x.dtype),
        grid_spec=pltpu.PrefetchScalarGridSpec(
            num_scalar_prefetch=0,
            grid=grid,
            in_specs=[
                pl.BlockSpec((tb, FLAT), lambda b: (b, 0)),   # batch block of x
                pl.BlockSpec((8, FLAT), lambda b: (0, 0)),    # pe: resident every step
            ],
            out_specs=pl.BlockSpec((tb, FLAT), lambda b: (b, 0)),
        ),
        compiler_params=pltpu.CompilerParams(
            dimension_semantics=("parallel",),
            vmem_limit_bytes=_VMEM_LIMIT_BYTES,
        ),
    )(x2d, pe8)

    return out2d.reshape(B, S, D)


if __name__ == "__main__":
    key = jax.random.PRNGKey(0)
    pe_full = _build_pe_table(D_MODEL, MAX_SEQ_LEN)
    pe_bcast = pe_full[:, :SEQ_LEN, :]

    # Small-batch case (matches the module's typical tiny test shape).
    B = 2
    x = jax.random.normal(key, (B, SEQ_LEN, D_MODEL), dtype=jnp.float32)
    ref = x + jnp.broadcast_to(pe_bcast, (B, SEQ_LEN, D_MODEL))
    out = positional_encoding_forward(x, pe_full)
    out = jax.block_until_ready(out)
    assert out.shape == (B, SEQ_LEN, D_MODEL)
    assert jnp.allclose(out, ref, atol=1e-6, rtol=1e-6)

    # Multi-step grid + partial last block case (exercises tb=16, grid=(2,)).
    B2 = 20
    x2 = jax.random.normal(jax.random.PRNGKey(1), (B2, SEQ_LEN, D_MODEL), dtype=jnp.float32)
    ref2 = x2 + jnp.broadcast_to(pe_bcast, (B2, SEQ_LEN, D_MODEL))
    out2 = positional_encoding_forward(x2, pe_full)
    out2 = jax.block_until_ready(out2)
    assert out2.shape == (B2, SEQ_LEN, D_MODEL)
    assert jnp.allclose(out2, ref2, atol=1e-6, rtol=1e-6)

    print("KERNEL_OK")
</pallas_src>

<mosaic_0001>
module attributes {stable_mosaic.version = 11 : i64} {
  func.func @_pe_add_kernel(%arg0: i32, %arg1: memref<2x5248xf32, #tpu.memory_space<vmem>>, %arg2: memref<8x5248xf32, #tpu.memory_space<vmem>>, %arg3: memref<2x5248xf32, #tpu.memory_space<vmem>>) attributes {dimension_semantics = [#tpu.dimension_semantics<parallel>], iteration_bounds = array<i64: 1>, scalar_prefetch = 0 : i64, scratch_operands = 0 : i64, tpu.core_type = #tpu.core_type<tc>, window_params = [{transform_indices = @transform_0, window_bounds = array<i64: 2, 5248>}, {pipeline_mode = #tpu.pipeline_mode<synchronous>, transform_indices = @transform_1, window_bounds = array<i64: 8, 5248>}, {transform_indices = @transform_2, window_bounds = array<i64: 2, 5248>}]} {
    %c0 = arith.constant 0 : index
    %c0_0 = arith.constant 0 : index
    %0 = vector.load %arg1[%c0, %c0_0] : memref<2x5248xf32, #tpu.memory_space<vmem>>, vector<2x5248xf32>
    %c0_1 = arith.constant 0 : index
    %c0_2 = arith.constant 0 : index
    %1 = vector.load %arg2[%c0_1, %c0_2] : memref<8x5248xf32, #tpu.memory_space<vmem>>, vector<8x5248xf32>
    %2 = vector.extract_strided_slice %1 {offsets = [0, 0], sizes = [2, 5248], strides = [1, 1]} : vector<8x5248xf32> to vector<2x5248xf32>
    %3 = arith.addf %0, %2 : vector<2x5248xf32>
    %c0_3 = arith.constant 0 : index
    %c0_4 = arith.constant 0 : index
    %4 = vector.load %arg3[%c0_3, %c0_4] : memref<2x5248xf32, #tpu.memory_space<vmem>>, vector<2x5248xf32>
    tpu.vector_store %arg3[%c0_3, %c0_4], %3 {strides = array<i32>} : memref<2x5248xf32, #tpu.memory_space<vmem>>, vector<2x5248xf32>,
    return
  }
  func.func @transform_0(%arg0: i32) -> (i32, i32) {
    %c0_i32 = arith.constant 0 : i32
    %c0_i32_0 = arith.constant 0 : i32
    return %arg0, %c0_i32 : i32, i32
  }
  func.func @transform_1(%arg0: i32) -> (i32, i32) {
    %c0_i32 = arith.constant 0 : i32
    %c0_i32_0 = arith.constant 0 : i32
    %c0_i32_1 = arith.constant 0 : i32
    return %c0_i32, %c0_i32_0 : i32, i32
  }
  func.func @transform_2(%arg0: i32) -> (i32, i32) {
    %c0_i32 = arith.constant 0 : i32
    %c0_i32_0 = arith.constant 0 : i32
    return %arg0, %c0_i32 : i32, i32
  }
}

</mosaic_0001>

<bundles_post_ra>
// kernel: tpu_custom_call.1
= control target key start
LH: loop header
LB: loop body
LE: loop exit
PB: predicated region body
PF: predicated region fallthrough
CT: control target
= control target key end

     0   :  { %7 = vsyncpa [#allocation3], 0  ;;  %s496_s0 = inlined_call_operand.hbm [shape: f32[2,5248], index: 0, kind: input, shape index: {}]   ;;  %s497_s1 = inlined_call_operand.hbm [shape: f32[8,5248], index: 1, kind: input, shape index: {}]   ;;  %s498_s2 = inlined_call_operand.hbm [shape: f32[2,5248], index: 2, kind: output, shape index: {}]  }
   0x1   :  { %8 = vsyncpa [#allocation6], 0 }
   0x2   :  { %9 = vsyncpa [#allocation4], 0  ;;  %s446_s9 = smov [#allocation2]   ;;  %s447_s11 = smov [#allocation5]  }
   0x3   :  { %s16_s10 = sshll.u32 %s446_s9, 4  ;;  %s26_s12 = sshll.u32 %s447_s11, 4  ;;  %s17_s10 = int_to_ptr.vmem [resolvable:$true] %s16_s10  ;;  %s27_s12 = int_to_ptr.vmem [resolvable:$true] %s26_s12 }
   0x4   :  { %s388_s13 = scalar_lea.vmem %s17_s10, 1312  ;;  %p393_p1 = scmp.lt.s32.totalorder %s17_s10, %s17_s10 }
   0x5   :  { %p389_p0 = scmp.ne.s32.totalorder %s17_s10, %s388_s13  ;;  %p394_p2 = scmp.lt.s32.totalorder %s388_s13, %s388_s13 }
   0x7   :  { %p395_p3 = por %p394_p2, %p393_p1 }
   0x9   :  { %p396_p4 = pnand %p395_p3, %p389_p0 }
   0xb   :  { %399 = shalt.err (!%p396_p4)
}
   0xc   :  { %19 = dma.hbm_to_vmem [thread:$0]  %s496_s0, 1312, %s17_s10, [#allocation3]  }
   0xd   :  { %s408_s16 = scalar_lea.vmem %s27_s12, 5248  ;;  %p413_p6 = scmp.lt.s32.totalorder %s27_s12, %s27_s12 }
   0xe   :  { %p409_p5 = scmp.ne.s32.totalorder %s27_s12, %s408_s16  ;;  %p414_p7 = scmp.lt.s32.totalorder %s408_s16, %s408_s16 }
  0x10   :  { %p415_p8 = por %p414_p7, %p413_p6 }
  0x12   :  { %p416_p9 = pnand %p415_p8, %p409_p5 }
  0x14   :  { %419 = shalt.err (!%p416_p9)
}
  0x15   :  { %29 = dma.hbm_to_vmem [thread:$0]  %s497_s1, 5248, %s27_s12, [#allocation6]  }
  0x16   :  { %440 = dma.done.wait [#allocation3], 1312  }
  0x17   :  { %441 = vsyncadd [#allocation3], 4294965984 }
  0x18   :  { %442 = dma.done.wait [#allocation6], 5248  }
  0x19   :  { %443 = vsyncadd [#allocation6], 4294962048  ;;  %v134_v0 = vlaneseq  ;;  %v448_v1 = vmov 1983009808   ;;  %v360_v6 = vld [vmem:[#allocation5] ss:$8 sps:$4 sm:$0xff]  }
  0x1a   :  { %v132_v2 = vunpack.c.l.s4 %v448_v1  ;;  %v361_v7 = vld [vmem:[#allocation5 + $0x10] ss:$8 sps:$4 sm:$0xff]   ;;  %v362_v11 = vld [vmem:[#allocation5 + $0x20] ss:$8 sps:$4 sm:$0xff]   ;;  %s449_s0 = smov [#allocation7]  }
  0x1b   :  { %v135_v3 = vshrl.u32 %v134_v0, 7  ;;  %v36_v9 = vld [vmem:[#allocation2] sm:$0xff]  ;;  %v364_v16 = vld [vmem:[#allocation5 + $0x40] ss:$8 sps:$4 sm:$0xff]   ;;  %v37_v18 = vld [vmem:[#allocation2 + $0x8] sm:$0xff]  ;;  %s345_s1 = sshll.u32 %s449_s0, 4  ;;  %s346_s1 = int_to_ptr.vmem [resolvable:$true] %s345_s1 }
  0x1c   :  { %v133_v4 = vunpack.c.0.s8 %v132_v2  ;;  %v363_v12 = vld [vmem:[#allocation5 + $0x30] ss:$8 sps:$4 sm:$0xff]   ;;  %v366_v23 = vld [vmem:[#allocation5 + $0x60] ss:$8 sps:$4 sm:$0xff]   ;;  %s420_s19 = scalar_lea.vmem %s346_s1, 1312  ;;  %p425_p11 = scmp.lt.s32.totalorder %s346_s1, %s346_s1 }
  0x1d   :  { %v365_v17 = vld [vmem:[#allocation5 + $0x50] ss:$8 sps:$4 sm:$0xff]   ;;  %v38_v24 = vld [vmem:[#allocation2 + $0x10] sm:$0xff]  ;;  %v39_v29 = vld [vmem:[#allocation2 + $0x18] sm:$0xff]  ;;  %p421_p10 = scmp.ne.s32.totalorder %s346_s1, %s420_s19  ;;  %p426_p12 = scmp.lt.s32.totalorder %s420_s19, %s420_s19 }
  0x1e   :  { %v471_v5 = vsub.s32 %v133_v4, %v135_v3  ;;  %v367_v25 = vld [vmem:[#allocation5 + $0x70] ss:$8 sps:$4 sm:$0xff]   ;;  %v368_v31 = vld [vmem:[#allocation5 + $0x80] ss:$8 sps:$4 sm:$0xff]   ;;  %v46_v4 = vld [vmem:[#allocation2 + $0x50] sm:$0x3] }
  0x1f   :  { %v369_v32 = vld [vmem:[#allocation5 + $0x90] ss:$8 sps:$4 sm:$0xff]   ;;  %v370_v37 = vld [vmem:[#allocation5 + $0xa0] ss:$8 sps:$4 sm:$0xff]   ;;  %p427_p13 = por %p426_p12, %p425_p11 }
  0x20   :  { %v137_v8 = vrot.slane %v360_v6, %v471_v5  ;;  %v144_v10 = vrot.slane %v361_v7, %v471_v5  ;;  %v154_v14 = vrot.slane %v362_v11, %v471_v5  ;;  %v161_v15 = vrot.slane %v363_v12, %v471_v5  ;;  %v371_v38 = vld [vmem:[#allocation5 + $0xb0] ss:$8 sps:$4 sm:$0xff]   ;;  %v372_v44 = vld [vmem:[#allocation5 + $0xc0] ss:$8 sps:$4 sm:$0xff]  }
  0x21   :  { %v171_v21 = vrot.slane %v364_v16, %v471_v5  ;;  %v178_v22 = vrot.slane %v365_v17, %v471_v5  ;;  %v188_v28 = vrot.slane %v366_v23, %v471_v5  ;;  %v195_v30 = vrot.slane %v367_v25, %v471_v5  ;;  %v40_v39 = vld [vmem:[#allocation2 + $0x20] sm:$0xff]  ;;  %v41_v45 = vld [vmem:[#allocation2 + $0x28] sm:$0xff]  ;;  %v42_v50 = vld [vmem:[#allocation2 + $0x30] sm:$0xff]  ;;  %p428_p0 = pnand %p427_p13, %p421_p10 }
  0x22   :  { %v145_v13 = vcombine.low %v137_v8, %v144_v10  ;;  %v162_v20 = vcombine.low %v154_v14, %v161_v15  ;;  %v205_v35 = vrot.slane %v368_v31, %v471_v5  ;;  %v212_v36 = vrot.slane %v369_v32, %v471_v5  ;;  %v373_v46 = vld [vmem:[#allocation5 + $0xd0] ss:$8 sps:$4 sm:$0xff]   ;;  %v374_v52 = vld [vmem:[#allocation5 + $0xe0] ss:$8 sps:$4 sm:$0xff]  }
  0x23   :  { %v179_v27 = vcombine.low %v171_v21, %v178_v22  ;;  %v196_v34 = vcombine.low %v188_v28, %v195_v30  ;;  %v222_v42 = vrot.slane %v370_v37, %v471_v5  ;;  %v229_v43 = vrot.slane %v371_v38, %v471_v5  ;;  %v375_v53 = vld [vmem:[#allocation5 + $0xf0] ss:$8 sps:$4 sm:$0xff]   ;;  %v376_v58 = vld [vmem:[#allocation5 + $0x100] ss:$8 sps:$4 sm:$0xff]  }
  0x24   :  { %v317_v19 = vadd.f32 %v145_v13, %v36_v9  ;;  %v318_v26 = vadd.f32 %v162_v20, %v37_v18  ;;  %v213_v41 = vcombine.low %v205_v35, %v212_v36  ;;  %v239_v49 = vrot.slane %v372_v44, %v471_v5  ;;  %v377_v59 = vld [vmem:[#allocation5 + $0x110] ss:$8 sps:$4 sm:$0xff]   ;;  %v43_v60 = vld [vmem:[#allocation2 + $0x38] sm:$0xff] }
  0x25   :  { %v319_v33 = vadd.f32 %v179_v27, %v38_v24  ;;  %v320_v40 = vadd.f32 %v196_v34, %v39_v29  ;;  %v230_v48 = vcombine.low %v222_v42, %v229_v43  ;;  %v246_v51 = vrot.slane %v373_v46, %v471_v5  ;;  %v378_v1 = vld [vmem:[#allocation5 + $0x120] ss:$8 sps:$4 sm:$0xff]   ;;  %v44_v2 = vld [vmem:[#allocation2 + $0x40] sm:$0xff]  ;;  %v45_v13 = vld [vmem:[#allocation2 + $0x48] sm:$0xff] }
  0x26   :  { %328 = vst [vmem:[#allocation7] sm:$0xff] %v317_v19  ;;  %329 = vst [vmem:[#allocation7 + $0x8] sm:$0xff] %v318_v26  ;;  %v321_v47 = vadd.f32 %v213_v41, %v40_v39  ;;  %v256_v56 = vrot.slane %v374_v52, %v471_v5  ;;  %v263_v57 = vrot.slane %v375_v53, %v471_v5  ;;  %v379_v3 = vld [vmem:[#allocation5 + $0x130] ss:$8 sps:$4 sm:$0xff]  }
  0x27   :  { %330 = vst [vmem:[#allocation7 + $0x10] sm:$0xff] %v319_v33  ;;  %331 = vst [vmem:[#allocation7 + $0x18] sm:$0xff] %v320_v40  ;;  %v322_v54 = vadd.f32 %v230_v48, %v41_v45  ;;  %v247_v55 = vcombine.low %v239_v49, %v246_v51  ;;  %v273_v63 = vrot.slane %v376_v58, %v471_v5  ;;  %v355_v9 = vld.sshfl [vmem:[#allocation5 + $0x140] sm:$0xff pattern:$0x76325410] }
  0x28   :  { %332 = vst [vmem:[#allocation7 + $0x20] sm:$0xff] %v321_v47  ;;  %v264_v62 = vcombine.low %v256_v56, %v263_v57  ;;  %v280_v0 = vrot.slane %v377_v59, %v471_v5  ;;  %v290_v8 = vrot.slane %v378_v1, %v471_v5  ;;  %v297_v10 = vrot.slane %v379_v3, %v471_v5 }
  0x29   :  { %333 = vst [vmem:[#allocation7 + $0x28] sm:$0xff] %v322_v54  ;;  %v323_v61 = vadd.f32 %v247_v55, %v42_v50  ;;  %v327_v11 = vadd.f32 %v355_v9, %v46_v4 }
  0x2a   :  { %v324_v6 = vadd.f32 %v264_v62, %v43_v60  ;;  %v281_v7 = vcombine.low %v273_v63, %v280_v0  ;;  %v298_v14 = vcombine.low %v290_v8, %v297_v10 }
  0x2b   :  { %334 = vst [vmem:[#allocation7 + $0x30] sm:$0xff] %v323_v61  ;;  %338 = vst [vmem:[#allocation7 + $0x50] sm:$0x3] %v327_v11 }
  0x2c   :  { %335 = vst [vmem:[#allocation7 + $0x38] sm:$0xff] %v324_v6  ;;  %v325_v12 = vadd.f32 %v281_v7, %v44_v2  ;;  %v326_v15 = vadd.f32 %v298_v14, %v45_v13 }
  0x2e   :  { %336 = vst [vmem:[#allocation7 + $0x40] sm:$0xff] %v325_v12  ;;  %337 = vst [vmem:[#allocation7 + $0x48] sm:$0xff] %v326_v15 }
  0x2f   :  { %431 = shalt.err (!%p428_p0)
}
  0x30   :  { %348 = dma.vmem_to_hbm [thread:$0]  %s346_s1, 1312, %s498_s2, [#allocation4]  }
  0x31   :  { %444 = dma.done.wait [#allocation4], 1312  }
  0x32   :  { %445 = vsyncadd [#allocation4], 4294965984 }
  0x33   :  { %352 = vsyncpa [#allocation3], 1 }
  0x34   :  { %353 = vsyncpa [#allocation6], 1 }
  0x35   :  { %354 = vsyncpa [#allocation4], 1 }

</bundles_post_ra>
